<compile_context>
chip_gen: v7x
topology: tpu7x:2x2x1
jax: 0.10.0
libtpu: 0.0.40
codegen_flags: <defaults>
</compile_context>

<pallas_src>
import functools

import jax
import jax.numpy as jnp
from jax.experimental import pallas as pl
from jax.experimental.pallas import tpu as pltpu

EPS = 1e-5
PAD_TOP = 8   # real rows live at sublane-aligned offset 8; rows 7 / 8+NH are halos


def _sigmoid(z):
    # One EUP transcendental (tanh) instead of exp + true-divide on the VPU.
    return 0.5 * jnp.tanh(0.5 * z) + 0.5


# ----------------------------------------------------------------------------
# Fused kernel: conv1 GEMMs + shortcut GEMM -> BN1 -> sigmoid -> conv2 GEMMs
# -> BN2/BNs -> add -> sigmoid, everything resident in VMEM / vregs.
# ----------------------------------------------------------------------------
def _fused_block_kernel(x_ref, w1b_ref, wsb_ref, w2b_ref, gw_ref, bw_ref,
                        o_ref, pad_ref, *, N, H, W, cout, cp):
    NH = N * H
    wc_in = W * cp
    wc_out = W * cout
    inv_cnt = 1.0 / float(NH * W)

    # Rows of the shifted slabs whose vertical tap would cross an image border.
    row = jax.lax.broadcasted_iota(jnp.int32, (NH, 1), 0)
    top_ok = (row % H) != 0            # ky = 0 taps row h-1
    bot_ok = (row % H) != (H - 1)      # ky = 2 taps row h+1

    def lane_group_sums(stats):
        # stats: (R, wc_out).  Circular lane-roll butterfly; every lane ends up
        # holding the total over all lanes with the same index mod cout, i.e.
        # the per-channel sum already broadcast to the wide layout.
        s = stats
        shift = cout
        while shift < wc_out:
            s = s + pltpu.roll(s, shift=shift, axis=1)
            shift *= 2
        return s

    def batchnorm(ys, idxs):
        # One-pass batch statistics (sum and sum-of-squares together); all
        # tensors in `ys` share a single roll butterfly.
        stats = jnp.concatenate(
            [jnp.concatenate([jnp.sum(y, axis=0, keepdims=True),
                              jnp.sum(y * y, axis=0, keepdims=True)], axis=0)
             for y in ys], axis=0)                            # (2*len, wc_out)
        stats = lane_group_sums(stats) * inv_cnt
        outs = []
        for k, (y, idx) in enumerate(zip(ys, idxs)):
            mean = stats[2 * k:2 * k + 1, :]
            var = stats[2 * k + 1:2 * k + 2, :] - mean * mean
            scale = gw_ref[idx:idx + 1, :] * jax.lax.rsqrt(var + EPS)
            beta = bw_ref[idx:idx + 1, :] - mean * scale
            outs.append(y * scale + beta)
        return outs

    def conv3x3(w_ref, width):
        # 3x3 'same' conv over the wide layout = three accumulating K = width
        # GEMMs; LHS slabs are direct slices of the shared padded scratch and
        # cross-image taps are masked to zero.  Operands cast to bf16 only at
        # the MXU boundary; accumulation stays f32.
        lhs1 = pad_ref[PAD_TOP:PAD_TOP + NH, :width].astype(jnp.bfloat16)
        lhs0 = jnp.where(top_ok,
                         pad_ref[PAD_TOP - 1:PAD_TOP - 1 + NH, :width], 0.0)
        lhs2 = jnp.where(bot_ok,
                         pad_ref[PAD_TOP + 1:PAD_TOP + 1 + NH, :width], 0.0)
        acc = jnp.dot(lhs0.astype(jnp.bfloat16), w_ref[0],
                      preferred_element_type=jnp.float32)
        acc = acc + jnp.dot(lhs1, w_ref[1], preferred_element_type=jnp.float32)
        acc = acc + jnp.dot(lhs2.astype(jnp.bfloat16), w_ref[2],
                            preferred_element_type=jnp.float32)
        return acc, lhs1

    # ---- zero ONLY the two halo rows the shifted slabs can read ------------
    zero_row = jnp.zeros((1, pad_ref.shape[1]), jnp.float32)
    pad_ref[PAD_TOP - 1:PAD_TOP, :] = zero_row
    pad_ref[PAD_TOP + NH:PAD_TOP + NH + 1, :] = zero_row

    # ---- stage x, conv1 (3x3) + 1x1 projection shortcut --------------------
    pad_ref[PAD_TOP:PAD_TOP + NH, :wc_in] = x_ref[...]
    c1, x_mid = conv3x3(w1b_ref, wc_in)
    sc = jnp.dot(x_mid, wsb_ref[...], preferred_element_type=jnp.float32)

    # ---- BN1 + sigmoid; a1 reuses the SAME scratch rows (x is dead) --------
    a1 = _sigmoid(batchnorm([c1], [0])[0])
    pad_ref[PAD_TOP:PAD_TOP + NH, :wc_out] = a1

    # ---- conv2 (3x3) --------------------------------------------------------
    c2, _ = conv3x3(w2b_ref, wc_out)

    # ---- BN2 + BN_shortcut (shared butterfly) + add + sigmoid --------------
    y2, ysc = batchnorm([c2, sc], [1, 2])
    o_ref[...] = _sigmoid(y2 + ysc)          # one unmasked lane-dense store


# ----------------------------------------------------------------------------
# One-time parameter packing (hoisted OUT of the per-call path).
# ----------------------------------------------------------------------------
def _banded_conv3x3_weight(w_hwio, W):
    """(3,3,Ci,Co) -> (3, W*Ci, W*Co): per-ky banded row-GEMM weights so that
    sum_ky lhs_ky @ band[ky], with lhs_ky[(n,h), w'*Ci+ci] = x[n, h+ky-1, w', ci],
    equals a 3x3 'same' convolution (width halo folded into the band)."""
    Ci, Co = w_hwio.shape[2], w_hwio.shape[3]
    wq = jnp.arange(W)
    kx = jnp.arange(3)
    sel = (wq[:, None, None] == wq[None, :, None] + kx[None, None, :] - 1)
    sel = sel.astype(jnp.float32)                            # sel[w', w, kx]
    band = jnp.einsum('pwx,yxic->ypiwc', sel, w_hwio)        # (ky, w', Ci, w, Co)
    return band.reshape(3, W * Ci, W * Co)


def _banded_conv1x1_weight(w_ic, W):
    """(Ci,Co) -> (W*Ci, W*Co) block-diagonal row-GEMM weight (1x1 conv)."""
    Ci, Co = w_ic.shape
    band = jnp.einsum('pw,ic->piwc', jnp.eye(W, dtype=jnp.float32), w_ic)
    return band.reshape(W * Ci, W * Co)


def pack_my_block1_params(p, W):
    """Call ONCE at init: re-pack conv/BN parameters into the banded bf16 GEMM
    form the kernel consumes (removes all per-call wrapper packing cost)."""
    Cout, Cin = p["w1"].shape[0], p["w1"].shape[1]
    cp = ((Cin + 7) // 8) * 8                       # lane-friendly padded Cin
    w1_hwio = jnp.pad(jnp.transpose(p["w1"], (2, 3, 1, 0)),
                      ((0, 0), (0, 0), (0, cp - Cin), (0, 0)))        # (3,3,cp,Cout)
    w2_hwio = jnp.transpose(p["w2"], (2, 3, 1, 0))                    # (3,3,Cout,Cout)
    ws_ic = jnp.pad(p["ws"][:, :, 0, 0].T, ((0, cp - Cin), (0, 0)))   # (cp,Cout)

    def widen(v):                                   # (Cout,) -> (W*Cout,)
        return jnp.tile(v, (W,))

    return {
        "w1b": _banded_conv3x3_weight(w1_hwio, W).astype(jnp.bfloat16),
        "w2b": _banded_conv3x3_weight(w2_hwio, W).astype(jnp.bfloat16),
        "wsb": _banded_conv1x1_weight(ws_ic, W).astype(jnp.bfloat16),
        "gw": jnp.stack([widen(p["g1"]), widen(p["g2"]), widen(p["gs"])]),
        "bw": jnp.stack([widen(p["b1"]), widen(p["b2"]), widen(p["bs"])]),
    }


# ----------------------------------------------------------------------------
# Forward wrappers.
# ----------------------------------------------------------------------------
def my_block1_forward_rows(x_rows, packed, *, N, H, W):
    """Lane-dense entry point: x_rows is (N*H, W*cp) f32 with channels
    innermost; returns (N*H, W*Cout) f32 in the same layout.  Keep this layout
    when chaining blocks; only relayout at network boundaries."""
    NH = N * H
    cp = packed["w1b"].shape[1] // W
    cout = packed["w1b"].shape[2] // W
    wc_in, wc_out = W * cp, W * cout
    wc_max = max(wc_in, wc_out)
    assert W & (W - 1) == 0, "roll-based channel reduction assumes W = 2**k"

    scratch_rows = PAD_TOP + NH + 1
    # Explicit VMEM footprint guard for the resident-everything design.
    in_bytes = (x_rows.size * 4
                + sum(int(packed[k].size) * packed[k].dtype.itemsize
                      for k in ("w1b", "w2b", "wsb", "gw", "bw")))
    out_bytes = NH * wc_out * 4
    scratch_bytes = scratch_rows * wc_max * 4
    footprint = in_bytes + out_bytes + scratch_bytes
    assert footprint < 48 * 2 ** 20, (
        "resident-everything footprint too large; tile over N/H with a grid")
    vmem_limit = int(min(max(4 * footprint, 32 * 2 ** 20), 64 * 2 ** 20))

    cost = pl.CostEstimate(
        flops=2 * NH * (4 * wc_in * wc_out + 3 * wc_out * wc_out),
        transcendentals=2 * NH * wc_out,
        bytes_accessed=in_bytes + out_bytes)

    kernel = functools.partial(_fused_block_kernel,
                               N=N, H=H, W=W, cout=cout, cp=cp)
    return pl.pallas_call(
        kernel,
        out_shape=jax.ShapeDtypeStruct((NH, wc_out), jnp.float32),
        in_specs=[pl.BlockSpec(memory_space=pltpu.MemorySpace.VMEM)] * 6,
        out_specs=pl.BlockSpec(memory_space=pltpu.MemorySpace.VMEM),
        scratch_shapes=[pltpu.VMEM((scratch_rows, wc_max), jnp.float32)],
        compiler_params=pltpu.CompilerParams(vmem_limit_bytes=vmem_limit),
        cost_estimate=cost,
    )(x_rows, packed["w1b"], packed["wsb"], packed["w2b"],
      packed["gw"], packed["bw"])


def my_block1_forward(x_nchw, packed):
    """NCHW convenience wrapper around the lane-dense kernel entry point."""
    # TODO(synk): stride != 1 and the identity-shortcut (Cin == Cout) variants
    # of the block are not implemented (reference config uses the projection).
    N, Cin, H, W = x_nchw.shape
    cp = packed["w1b"].shape[1] // W
    cout = packed["w1b"].shape[2] // W
    x = jnp.transpose(x_nchw, (0, 2, 3, 1))
    x = jnp.pad(x, ((0, 0), (0, 0), (0, 0), (0, cp - Cin)))
    x_rows = x.reshape(N * H, W * cp)
    out_rows = my_block1_forward_rows(x_rows, packed, N=N, H=H, W=W)
    out = out_rows.reshape(N, H, W, cout)
    return jnp.transpose(out, (0, 3, 1, 2))


# ----------------------------------------------------------------------------
# Pure-JAX reference (module semantics, f32) for verification.
# ----------------------------------------------------------------------------
def _ref_forward(x, p):
    def conv(x, w, pad):
        return jax.lax.conv_general_dilated(
            x, w, (1, 1), [(pad, pad), (pad, pad)],
            dimension_numbers=("NCHW", "OIHW", "NCHW"))

    def bn(x, g, b):
        mean = x.mean(axis=(0, 2, 3), keepdims=True)
        var = x.var(axis=(0, 2, 3), keepdims=True)        # biased, training BN
        return ((x - mean) / jnp.sqrt(var + EPS)
                * g.reshape(1, -1, 1, 1) + b.reshape(1, -1, 1, 1))

    sig = lambda z: 1.0 / (1.0 + jnp.exp(-z))
    out = sig(bn(conv(x, p["w1"], 1), p["g1"], p["b1"]))
    out = bn(conv(out, p["w2"], 1), p["g2"], p["b2"])
    shortcut = bn(conv(x, p["ws"], 0), p["gs"], p["bs"])
    return sig(out + shortcut)


# ----------------------------------------------------------------------------
if __name__ == "__main__":
    N, Cin, Cout, H, W = 2, 4, 8, 16, 16      # Cin != Cout -> projection shortcut
    key = jax.random.PRNGKey(0)
    k1, k2, k3, k4, k5, kx = jax.random.split(key, 6)

    params = {
        "w1": jax.random.normal(k1, (Cout, Cin, 3, 3), jnp.float32) * 0.1,
        "w2": jax.random.normal(k2, (Cout, Cout, 3, 3), jnp.float32) * 0.1,
        "ws": jax.random.normal(k3, (Cout, Cin, 1, 1), jnp.float32) * 0.1,
        "g1": 1.0 + 0.1 * jax.random.normal(k4, (Cout,), jnp.float32),
        "b1": 0.1 * jax.random.normal(k5, (Cout,), jnp.float32),
        "g2": jnp.ones((Cout,), jnp.float32),
        "b2": jnp.zeros((Cout,), jnp.float32),
        "gs": jnp.ones((Cout,), jnp.float32),
        "bs": jnp.zeros((Cout,), jnp.float32),
    }
    x = jax.random.normal(kx, (N, Cin, H, W), jnp.float32)

    # Pack once (hoisted out of the jitted per-step forward).
    packed = pack_my_block1_params(params, W)
    packed = jax.tree_util.tree_map(jax.block_until_ready, packed)

    fwd = jax.jit(my_block1_forward)
    out = jax.block_until_ready(fwd(x, packed))
    ref = jax.block_until_ready(_ref_forward(x, params))

    assert out.shape == (N, Cout, H, W) and out.dtype == jnp.float32
    err = jnp.max(jnp.abs(out - ref))
    # bf16 MXU operands (weights + activations) vs the f32 reference: relax the
    # pure-f32 tolerance accordingly (BN/sigmoid math stays f32 in-kernel).
    assert jnp.allclose(out, ref, atol=1e-2, rtol=1e-2), f"max abs err {err}"
    print("KERNEL_OK")
</pallas_src>

<mosaic_0001>
module attributes {stable_mosaic.version = 11 : i64} {
  func.func @_fused_block_kernel(%arg0: memref<32x128xf32, #tpu.memory_space<vmem>>, %arg1: memref<3x128x128xbf16, #tpu.memory_space<vmem>>, %arg2: memref<128x128xbf16, #tpu.memory_space<vmem>>, %arg3: memref<3x128x128xbf16, #tpu.memory_space<vmem>>, %arg4: memref<3x128xf32, #tpu.memory_space<vmem>>, %arg5: memref<3x128xf32, #tpu.memory_space<vmem>>, %arg6: memref<32x128xf32, #tpu.memory_space<vmem>>, %arg7: memref<41x128xf32, #tpu.memory_space<vmem>>) attributes {dimension_semantics = [], scalar_prefetch = 0 : i64, scratch_operands = 1 : i64, tpu.core_type = #tpu.core_type<tc>} {
    %0 = tpu.iota {dimensions = array<i32: 0>} : vector<32x1xi32>
    %c16_i32 = arith.constant 16 : i32
    %c0_i32 = arith.constant 0 : i32
    %1 = arith.cmpi eq, %c16_i32, %c0_i32 : i32
    %c1_i32 = arith.constant 1 : i32
    %2 = arith.select %1, %c1_i32, %c16_i32 : i32
    %3 = vector.broadcast %2 : i32 to vector<32x1xi32>
    %4 = arith.remsi %0, %3 : vector<32x1xi32>
    %c0_i32_0 = arith.constant 0 : i32
    %5 = vector.broadcast %c0_i32_0 : i32 to vector<32x1xi32>
    %6 = arith.cmpi ne, %4, %5 : vector<32x1xi32>
    %c0_i32_1 = arith.constant 0 : i32
    %7 = vector.broadcast %c0_i32_1 : i32 to vector<32x1xi32>
    %8 = arith.cmpi slt, %4, %7 : vector<32x1xi32>
    %c0_i32_2 = arith.constant 0 : i32
    %9 = arith.cmpi slt, %2, %c0_i32_2 : i32
    %10 = vector.broadcast %9 : i1 to vector<32x1xi1>
    %11 = vector.broadcast %10 : vector<32x1xi1> to vector<32x1xi1>
    %12 = arith.xori %8, %11 : vector<32x1xi1>
    %13 = arith.andi %12, %6 : vector<32x1xi1>
    %14 = vector.broadcast %2 : i32 to vector<32x1xi32>
    %15 = arith.addi %4, %14 : vector<32x1xi32>
    %16 = arith.select %13, %15, %4 : vector<32x1xi1>, vector<32x1xi32>
    %c0_i32_3 = arith.constant 0 : i32
    %17 = vector.broadcast %c0_i32_3 : i32 to vector<32x1xi32>
    %18 = arith.cmpi ne, %16, %17 : vector<32x1xi32>
    %c16_i32_4 = arith.constant 16 : i32
    %c0_i32_5 = arith.constant 0 : i32
    %19 = arith.cmpi eq, %c16_i32_4, %c0_i32_5 : i32
    %c1_i32_6 = arith.constant 1 : i32
    %20 = arith.select %19, %c1_i32_6, %c16_i32_4 : i32
    %21 = vector.broadcast %20 : i32 to vector<32x1xi32>
    %22 = arith.remsi %0, %21 : vector<32x1xi32>
    %c0_i32_7 = arith.constant 0 : i32
    %23 = vector.broadcast %c0_i32_7 : i32 to vector<32x1xi32>
    %24 = arith.cmpi ne, %22, %23 : vector<32x1xi32>
    %c0_i32_8 = arith.constant 0 : i32
    %25 = vector.broadcast %c0_i32_8 : i32 to vector<32x1xi32>
    %26 = arith.cmpi slt, %22, %25 : vector<32x1xi32>
    %c0_i32_9 = arith.constant 0 : i32
    %27 = arith.cmpi slt, %20, %c0_i32_9 : i32
    %28 = vector.broadcast %27 : i1 to vector<32x1xi1>
    %29 = vector.broadcast %28 : vector<32x1xi1> to vector<32x1xi1>
    %30 = arith.xori %26, %29 : vector<32x1xi1>
    %31 = arith.andi %30, %24 : vector<32x1xi1>
    %32 = vector.broadcast %20 : i32 to vector<32x1xi32>
    %33 = arith.addi %22, %32 : vector<32x1xi32>
    %34 = arith.select %31, %33, %22 : vector<32x1xi1>, vector<32x1xi32>
    %c15_i32 = arith.constant 15 : i32
    %35 = vector.broadcast %c15_i32 : i32 to vector<32x1xi32>
    %36 = arith.cmpi ne, %34, %35 : vector<32x1xi32>
    %cst = arith.constant 0.000000e+00 : f32
    %37 = vector.broadcast %cst : f32 to vector<1x128xf32>
    %c7 = arith.constant 7 : index
    %c0 = arith.constant 0 : index
    %38 = vector.load %arg7[%c7, %c0] : memref<41x128xf32, #tpu.memory_space<vmem>>, vector<1x128xf32>
    tpu.vector_store %arg7[%c7, %c0], %37 {strides = array<i32>} : memref<41x128xf32, #tpu.memory_space<vmem>>, vector<1x128xf32>,
    %c40 = arith.constant 40 : index
    %c0_10 = arith.constant 0 : index
    %39 = vector.load %arg7[%c40, %c0_10] : memref<41x128xf32, #tpu.memory_space<vmem>>, vector<1x128xf32>
    tpu.vector_store %arg7[%c40, %c0_10], %37 {strides = array<i32>} : memref<41x128xf32, #tpu.memory_space<vmem>>, vector<1x128xf32>,
    %c0_11 = arith.constant 0 : index
    %c0_12 = arith.constant 0 : index
    %40 = vector.load %arg0[%c0_11, %c0_12] : memref<32x128xf32, #tpu.memory_space<vmem>>, vector<32x128xf32>
    %c8 = arith.constant 8 : index
    %c0_13 = arith.constant 0 : index
    %41 = vector.load %arg7[%c8, %c0_13] : memref<41x128xf32, #tpu.memory_space<vmem>>, vector<32x128xf32>
    tpu.vector_store %arg7[%c8, %c0_13], %40 {strides = array<i32>} : memref<41x128xf32, #tpu.memory_space<vmem>>, vector<32x128xf32>,
    %c8_14 = arith.constant 8 : index
    %c0_15 = arith.constant 0 : index
    %42 = vector.load %arg7[%c8_14, %c0_15] : memref<41x128xf32, #tpu.memory_space<vmem>>, vector<32x128xf32>
    %43 = arith.truncf %42 : vector<32x128xf32> to vector<32x128xbf16>
    %c7_16 = arith.constant 7 : index
    %c0_17 = arith.constant 0 : index
    %44 = vector.load %arg7[%c7_16, %c0_17] : memref<41x128xf32, #tpu.memory_space<vmem>>, vector<32x128xf32>
    %cst_18 = arith.constant 0.000000e+00 : f32
    %45 = vector.shape_cast %18 : vector<32x1xi1> to vector<32x1xi1>
    %46 = vector.broadcast %45 : vector<32x1xi1> to vector<32x128xi1>
    %47 = vector.broadcast %cst_18 : f32 to vector<32x128xf32>
    %48 = arith.select %46, %44, %47 : vector<32x128xi1>, vector<32x128xf32>
    %c9 = arith.constant 9 : index
    %c0_19 = arith.constant 0 : index
    %49 = vector.load %arg7[%c9, %c0_19] : memref<41x128xf32, #tpu.memory_space<vmem>>, vector<32x128xf32>
    %cst_20 = arith.constant 0.000000e+00 : f32
    %50 = vector.shape_cast %36 : vector<32x1xi1> to vector<32x1xi1>
    %51 = vector.broadcast %50 : vector<32x1xi1> to vector<32x128xi1>
    %52 = vector.broadcast %cst_20 : f32 to vector<32x128xf32>
    %53 = arith.select %51, %49, %52 : vector<32x128xi1>, vector<32x128xf32>
    %54 = arith.truncf %48 : vector<32x128xf32> to vector<32x128xbf16>
    %c0_21 = arith.constant 0 : index
    %c0_22 = arith.constant 0 : index
    %c0_23 = arith.constant 0 : index
    %55 = vector.load %arg1[%c0_21, %c0_22, %c0_23] : memref<3x128x128xbf16, #tpu.memory_space<vmem>>, vector<1x128x128xbf16>
    %56 = vector.shape_cast %55 : vector<1x128x128xbf16> to vector<128x128xbf16>
    %cst_24 = arith.constant dense<0.000000e+00> : vector<32x128xf32>
    %57 = tpu.matmul %54, %56, %cst_24 {dimension_numbers = #tpu.dot_dimension_numbers<[1], [0], [0], [1], [0, 0, 1, 1], [], []>} : vector<32x128xbf16>, vector<128x128xbf16>, vector<32x128xf32> -> vector<32x128xf32>
    %c1 = arith.constant 1 : index
    %c0_25 = arith.constant 0 : index
    %c0_26 = arith.constant 0 : index
    %58 = vector.load %arg1[%c1, %c0_25, %c0_26] : memref<3x128x128xbf16, #tpu.memory_space<vmem>>, vector<1x128x128xbf16>
    %59 = vector.shape_cast %58 : vector<1x128x128xbf16> to vector<128x128xbf16>
    %cst_27 = arith.constant dense<0.000000e+00> : vector<32x128xf32>
    %60 = tpu.matmul %43, %59, %cst_27 {dimension_numbers = #tpu.dot_dimension_numbers<[1], [0], [0], [1], [0, 0, 1, 1], [], []>} : vector<32x128xbf16>, vector<128x128xbf16>, vector<32x128xf32> -> vector<32x128xf32>
    %61 = arith.addf %57, %60 : vector<32x128xf32>
    %62 = arith.truncf %53 : vector<32x128xf32> to vector<32x128xbf16>
    %c2 = arith.constant 2 : index
    %c0_28 = arith.constant 0 : index
    %c0_29 = arith.constant 0 : index
    %63 = vector.load %arg1[%c2, %c0_28, %c0_29] : memref<3x128x128xbf16, #tpu.memory_space<vmem>>, vector<1x128x128xbf16>
    %64 = vector.shape_cast %63 : vector<1x128x128xbf16> to vector<128x128xbf16>
    %cst_30 = arith.constant dense<0.000000e+00> : vector<32x128xf32>
    %65 = tpu.matmul %62, %64, %cst_30 {dimension_numbers = #tpu.dot_dimension_numbers<[1], [0], [0], [1], [0, 0, 1, 1], [], []>} : vector<32x128xbf16>, vector<128x128xbf16>, vector<32x128xf32> -> vector<32x128xf32>
    %66 = arith.addf %61, %65 : vector<32x128xf32>
    %c0_31 = arith.constant 0 : index
    %c0_32 = arith.constant 0 : index
    %67 = vector.load %arg2[%c0_31, %c0_32] : memref<128x128xbf16, #tpu.memory_space<vmem>>, vector<128x128xbf16>
    %cst_33 = arith.constant dense<0.000000e+00> : vector<32x128xf32>
    %68 = tpu.matmul %43, %67, %cst_33 {dimension_numbers = #tpu.dot_dimension_numbers<[1], [0], [0], [1], [0, 0, 1, 1], [], []>} : vector<32x128xbf16>, vector<128x128xbf16>, vector<32x128xf32> -> vector<32x128xf32>
    %cst_34 = arith.constant dense<0.000000e+00> : vector<128xf32>
    %69 = vector.multi_reduction <add>, %66, %cst_34 [0] : vector<32x128xf32> to vector<128xf32>
    %70 = vector.shape_cast %69 : vector<128xf32> to vector<1x128xf32>
    %71 = arith.mulf %66, %66 : vector<32x128xf32>
    %cst_35 = arith.constant dense<0.000000e+00> : vector<128xf32>
    %72 = vector.multi_reduction <add>, %71, %cst_35 [0] : vector<32x128xf32> to vector<128xf32>
    %73 = vector.shape_cast %72 : vector<128xf32> to vector<1x128xf32>
    %74 = tpu.concatenate %70, %73 in 0 : vector<1x128xf32>, vector<1x128xf32> -> vector<2x128xf32>
    %c8_i32 = arith.constant 8 : i32
    %75 = tpu.dynamic_rotate %74 by %c8_i32 dim 1 : vector<2x128xf32>, i32 -> vector<2x128xf32>
    %76 = arith.addf %74, %75 : vector<2x128xf32>
    %c16_i32_36 = arith.constant 16 : i32
    %77 = tpu.dynamic_rotate %76 by %c16_i32_36 dim 1 : vector<2x128xf32>, i32 -> vector<2x128xf32>
    %78 = arith.addf %76, %77 : vector<2x128xf32>
    %c32_i32 = arith.constant 32 : i32
    %79 = tpu.dynamic_rotate %78 by %c32_i32 dim 1 : vector<2x128xf32>, i32 -> vector<2x128xf32>
    %80 = arith.addf %78, %79 : vector<2x128xf32>
    %c64_i32 = arith.constant 64 : i32
    %81 = tpu.dynamic_rotate %80 by %c64_i32 dim 1 : vector<2x128xf32>, i32 -> vector<2x128xf32>
    %82 = arith.addf %80, %81 : vector<2x128xf32>
    %cst_37 = arith.constant 0.001953125 : f32
    %83 = vector.broadcast %cst_37 : f32 to vector<2x128xf32>
    %84 = arith.mulf %82, %83 : vector<2x128xf32>
    %85 = vector.extract_strided_slice %84 {offsets = [0, 0], sizes = [1, 128], strides = [1, 1]} : vector<2x128xf32> to vector<1x128xf32>
    %86 = vector.extract_strided_slice %84 {offsets = [1, 0], sizes = [1, 128], strides = [1, 1]} : vector<2x128xf32> to vector<1x128xf32>
    %87 = arith.mulf %85, %85 : vector<1x128xf32>
    %88 = arith.subf %86, %87 : vector<1x128xf32>
    %c0_38 = arith.constant 0 : index
    %c0_39 = arith.constant 0 : index
    %89 = vector.load %arg4[%c0_38, %c0_39] : memref<3x128xf32, #tpu.memory_space<vmem>>, vector<1x128xf32>
    %cst_40 = arith.constant 9.99999974E-6 : f32
    %90 = vector.broadcast %cst_40 : f32 to vector<1x128xf32>
    %91 = arith.addf %88, %90 : vector<1x128xf32>
    %92 = math.rsqrt %91 : vector<1x128xf32>
    %93 = arith.mulf %89, %92 : vector<1x128xf32>
    %c0_41 = arith.constant 0 : index
    %c0_42 = arith.constant 0 : index
    %94 = vector.load %arg5[%c0_41, %c0_42] : memref<3x128xf32, #tpu.memory_space<vmem>>, vector<1x128xf32>
    %95 = arith.mulf %85, %93 : vector<1x128xf32>
    %96 = arith.subf %94, %95 : vector<1x128xf32>
    %97 = vector.broadcast %93 : vector<1x128xf32> to vector<32x128xf32>
    %98 = arith.mulf %66, %97 : vector<32x128xf32>
    %99 = vector.broadcast %96 : vector<1x128xf32> to vector<32x128xf32>
    %100 = arith.addf %98, %99 : vector<32x128xf32>
    %cst_43 = arith.constant 5.000000e-01 : f32
    %101 = vector.broadcast %cst_43 : f32 to vector<32x128xf32>
    %102 = arith.mulf %101, %100 : vector<32x128xf32>
    %103 = math.tanh %102 : vector<32x128xf32>
    %cst_44 = arith.constant 5.000000e-01 : f32
    %104 = vector.broadcast %cst_44 : f32 to vector<32x128xf32>
    %105 = arith.mulf %104, %103 : vector<32x128xf32>
    %cst_45 = arith.constant 5.000000e-01 : f32
    %106 = vector.broadcast %cst_45 : f32 to vector<32x128xf32>
    %107 = arith.addf %105, %106 : vector<32x128xf32>
    %c8_46 = arith.constant 8 : index
    %c0_47 = arith.constant 0 : index
    %108 = vector.load %arg7[%c8_46, %c0_47] : memref<41x128xf32, #tpu.memory_space<vmem>>, vector<32x128xf32>
    tpu.vector_store %arg7[%c8_46, %c0_47], %107 {strides = array<i32>} : memref<41x128xf32, #tpu.memory_space<vmem>>, vector<32x128xf32>,
    %c8_48 = arith.constant 8 : index
    %c0_49 = arith.constant 0 : index
    %109 = vector.load %arg7[%c8_48, %c0_49] : memref<41x128xf32, #tpu.memory_space<vmem>>, vector<32x128xf32>
    %110 = arith.truncf %109 : vector<32x128xf32> to vector<32x128xbf16>
    %c7_50 = arith.constant 7 : index
    %c0_51 = arith.constant 0 : index
    %111 = vector.load %arg7[%c7_50, %c0_51] : memref<41x128xf32, #tpu.memory_space<vmem>>, vector<32x128xf32>
    %cst_52 = arith.constant 0.000000e+00 : f32
    %112 = vector.shape_cast %18 : vector<32x1xi1> to vector<32x1xi1>
    %113 = vector.broadcast %112 : vector<32x1xi1> to vector<32x128xi1>
    %114 = vector.broadcast %cst_52 : f32 to vector<32x128xf32>
    %115 = arith.select %113, %111, %114 : vector<32x128xi1>, vector<32x128xf32>
    %c9_53 = arith.constant 9 : index
    %c0_54 = arith.constant 0 : index
    %116 = vector.load %arg7[%c9_53, %c0_54] : memref<41x128xf32, #tpu.memory_space<vmem>>, vector<32x128xf32>
    %cst_55 = arith.constant 0.000000e+00 : f32
    %117 = vector.shape_cast %36 : vector<32x1xi1> to vector<32x1xi1>
    %118 = vector.broadcast %117 : vector<32x1xi1> to vector<32x128xi1>
    %119 = vector.broadcast %cst_55 : f32 to vector<32x128xf32>
    %120 = arith.select %118, %116, %119 : vector<32x128xi1>, vector<32x128xf32>
    %121 = arith.truncf %115 : vector<32x128xf32> to vector<32x128xbf16>
    %c0_56 = arith.constant 0 : index
    %c0_57 = arith.constant 0 : index
    %c0_58 = arith.constant 0 : index
    %122 = vector.load %arg3[%c0_56, %c0_57, %c0_58] : memref<3x128x128xbf16, #tpu.memory_space<vmem>>, vector<1x128x128xbf16>
    %123 = vector.shape_cast %122 : vector<1x128x128xbf16> to vector<128x128xbf16>
    %cst_59 = arith.constant dense<0.000000e+00> : vector<32x128xf32>
    %124 = tpu.matmul %121, %123, %cst_59 {dimension_numbers = #tpu.dot_dimension_numbers<[1], [0], [0], [1], [0, 0, 1, 1], [], []>} : vector<32x128xbf16>, vector<128x128xbf16>, vector<32x128xf32> -> vector<32x128xf32>
    %c1_60 = arith.constant 1 : index
    %c0_61 = arith.constant 0 : index
    %c0_62 = arith.constant 0 : index
    %125 = vector.load %arg3[%c1_60, %c0_61, %c0_62] : memref<3x128x128xbf16, #tpu.memory_space<vmem>>, vector<1x128x128xbf16>
    %126 = vector.shape_cast %125 : vector<1x128x128xbf16> to vector<128x128xbf16>
    %cst_63 = arith.constant dense<0.000000e+00> : vector<32x128xf32>
    %127 = tpu.matmul %110, %126, %cst_63 {dimension_numbers = #tpu.dot_dimension_numbers<[1], [0], [0], [1], [0, 0, 1, 1], [], []>} : vector<32x128xbf16>, vector<128x128xbf16>, vector<32x128xf32> -> vector<32x128xf32>
    %128 = arith.addf %124, %127 : vector<32x128xf32>
    %129 = arith.truncf %120 : vector<32x128xf32> to vector<32x128xbf16>
    %c2_64 = arith.constant 2 : index
    %c0_65 = arith.constant 0 : index
    %c0_66 = arith.constant 0 : index
    %130 = vector.load %arg3[%c2_64, %c0_65, %c0_66] : memref<3x128x128xbf16, #tpu.memory_space<vmem>>, vector<1x128x128xbf16>
    %131 = vector.shape_cast %130 : vector<1x128x128xbf16> to vector<128x128xbf16>
    %cst_67 = arith.constant dense<0.000000e+00> : vector<32x128xf32>
    %132 = tpu.matmul %129, %131, %cst_67 {dimension_numbers = #tpu.dot_dimension_numbers<[1], [0], [0], [1], [0, 0, 1, 1], [], []>} : vector<32x128xbf16>, vector<128x128xbf16>, vector<32x128xf32> -> vector<32x128xf32>
    %133 = arith.addf %128, %132 : vector<32x128xf32>
    %cst_68 = arith.constant dense<0.000000e+00> : vector<128xf32>
    %134 = vector.multi_reduction <add>, %133, %cst_68 [0] : vector<32x128xf32> to vector<128xf32>
    %135 = vector.shape_cast %134 : vector<128xf32> to vector<1x128xf32>
    %136 = arith.mulf %133, %133 : vector<32x128xf32>
    %cst_69 = arith.constant dense<0.000000e+00> : vector<128xf32>
    %137 = vector.multi_reduction <add>, %136, %cst_69 [0] : vector<32x128xf32> to vector<128xf32>
    %138 = vector.shape_cast %137 : vector<128xf32> to vector<1x128xf32>
    %139 = tpu.concatenate %135, %138 in 0 : vector<1x128xf32>, vector<1x128xf32> -> vector<2x128xf32>
    %cst_70 = arith.constant dense<0.000000e+00> : vector<128xf32>
    %140 = vector.multi_reduction <add>, %68, %cst_70 [0] : vector<32x128xf32> to vector<128xf32>
    %141 = vector.shape_cast %140 : vector<128xf32> to vector<1x128xf32>
    %142 = arith.mulf %68, %68 : vector<32x128xf32>
    %cst_71 = arith.constant dense<0.000000e+00> : vector<128xf32>
    %143 = vector.multi_reduction <add>, %142, %cst_71 [0] : vector<32x128xf32> to vector<128xf32>
    %144 = vector.shape_cast %143 : vector<128xf32> to vector<1x128xf32>
    %145 = tpu.concatenate %141, %144 in 0 : vector<1x128xf32>, vector<1x128xf32> -> vector<2x128xf32>
    %146 = tpu.concatenate %139, %145 in 0 : vector<2x128xf32>, vector<2x128xf32> -> vector<4x128xf32>
    %c8_i32_72 = arith.constant 8 : i32
    %147 = tpu.dynamic_rotate %146 by %c8_i32_72 dim 1 : vector<4x128xf32>, i32 -> vector<4x128xf32>
    %148 = arith.addf %146, %147 : vector<4x128xf32>
    %c16_i32_73 = arith.constant 16 : i32
    %149 = tpu.dynamic_rotate %148 by %c16_i32_73 dim 1 : vector<4x128xf32>, i32 -> vector<4x128xf32>
    %150 = arith.addf %148, %149 : vector<4x128xf32>
    %c32_i32_74 = arith.constant 32 : i32
    %151 = tpu.dynamic_rotate %150 by %c32_i32_74 dim 1 : vector<4x128xf32>, i32 -> vector<4x128xf32>
    %152 = arith.addf %150, %151 : vector<4x128xf32>
    %c64_i32_75 = arith.constant 64 : i32
    %153 = tpu.dynamic_rotate %152 by %c64_i32_75 dim 1 : vector<4x128xf32>, i32 -> vector<4x128xf32>
    %154 = arith.addf %152, %153 : vector<4x128xf32>
    %cst_76 = arith.constant 0.001953125 : f32
    %155 = vector.broadcast %cst_76 : f32 to vector<4x128xf32>
    %156 = arith.mulf %154, %155 : vector<4x128xf32>
    %157 = vector.extract_strided_slice %156 {offsets = [0, 0], sizes = [1, 128], strides = [1, 1]} : vector<4x128xf32> to vector<1x128xf32>
    %158 = vector.extract_strided_slice %156 {offsets = [1, 0], sizes = [1, 128], strides = [1, 1]} : vector<4x128xf32> to vector<1x128xf32>
    %159 = arith.mulf %157, %157 : vector<1x128xf32>
    %160 = arith.subf %158, %159 : vector<1x128xf32>
    %c1_77 = arith.constant 1 : index
    %c0_78 = arith.constant 0 : index
    %161 = vector.load %arg4[%c1_77, %c0_78] : memref<3x128xf32, #tpu.memory_space<vmem>>, vector<1x128xf32>
    %cst_79 = arith.constant 9.99999974E-6 : f32
    %162 = vector.broadcast %cst_79 : f32 to vector<1x128xf32>
    %163 = arith.addf %160, %162 : vector<1x128xf32>
    %164 = math.rsqrt %163 : vector<1x128xf32>
    %165 = arith.mulf %161, %164 : vector<1x128xf32>
    %c1_80 = arith.constant 1 : index
    %c0_81 = arith.constant 0 : index
    %166 = vector.load %arg5[%c1_80, %c0_81] : memref<3x128xf32, #tpu.memory_space<vmem>>, vector<1x128xf32>
    %167 = arith.mulf %157, %165 : vector<1x128xf32>
    %168 = arith.subf %166, %167 : vector<1x128xf32>
    %169 = vector.broadcast %165 : vector<1x128xf32> to vector<32x128xf32>
    %170 = arith.mulf %133, %169 : vector<32x128xf32>
    %171 = vector.broadcast %168 : vector<1x128xf32> to vector<32x128xf32>
    %172 = arith.addf %170, %171 : vector<32x128xf32>
    %173 = vector.extract_strided_slice %156 {offsets = [2, 0], sizes = [1, 128], strides = [1, 1]} : vector<4x128xf32> to vector<1x128xf32>
    %174 = vector.extract_strided_slice %156 {offsets = [3, 0], sizes = [1, 128], strides = [1, 1]} : vector<4x128xf32> to vector<1x128xf32>
    %175 = arith.mulf %173, %173 : vector<1x128xf32>
    %176 = arith.subf %174, %175 : vector<1x128xf32>
    %c2_82 = arith.constant 2 : index
    %c0_83 = arith.constant 0 : index
    %177 = vector.load %arg4[%c2_82, %c0_83] : memref<3x128xf32, #tpu.memory_space<vmem>>, vector<1x128xf32>
    %cst_84 = arith.constant 9.99999974E-6 : f32
    %178 = vector.broadcast %cst_84 : f32 to vector<1x128xf32>
    %179 = arith.addf %176, %178 : vector<1x128xf32>
    %180 = math.rsqrt %179 : vector<1x128xf32>
    %181 = arith.mulf %177, %180 : vector<1x128xf32>
    %c2_85 = arith.constant 2 : index
    %c0_86 = arith.constant 0 : index
    %182 = vector.load %arg5[%c2_85, %c0_86] : memref<3x128xf32, #tpu.memory_space<vmem>>, vector<1x128xf32>
    %183 = arith.mulf %173, %181 : vector<1x128xf32>
    %184 = arith.subf %182, %183 : vector<1x128xf32>
    %185 = vector.broadcast %181 : vector<1x128xf32> to vector<32x128xf32>
    %186 = arith.mulf %68, %185 : vector<32x128xf32>
    %187 = vector.broadcast %184 : vector<1x128xf32> to vector<32x128xf32>
    %188 = arith.addf %186, %187 : vector<32x128xf32>
    %189 = arith.addf %172, %188 : vector<32x128xf32>
    %cst_87 = arith.constant 5.000000e-01 : f32
    %190 = vector.broadcast %cst_87 : f32 to vector<32x128xf32>
    %191 = arith.mulf %190, %189 : vector<32x128xf32>
    %192 = math.tanh %191 : vector<32x128xf32>
    %cst_88 = arith.constant 5.000000e-01 : f32
    %193 = vector.broadcast %cst_88 : f32 to vector<32x128xf32>
    %194 = arith.mulf %193, %192 : vector<32x128xf32>
    %cst_89 = arith.constant 5.000000e-01 : f32
    %195 = vector.broadcast %cst_89 : f32 to vector<32x128xf32>
    %196 = arith.addf %194, %195 : vector<32x128xf32>
    %c0_90 = arith.constant 0 : index
    %c0_91 = arith.constant 0 : index
    %197 = vector.load %arg6[%c0_90, %c0_91] : memref<32x128xf32, #tpu.memory_space<vmem>>, vector<32x128xf32>
    tpu.vector_store %arg6[%c0_90, %c0_91], %196 {strides = array<i32>} : memref<32x128xf32, #tpu.memory_space<vmem>>, vector<32x128xf32>,
    return
  }
}

</mosaic_0001>

<bundles_post_ra>
// kernel: my_block1_forward.1
= control target key start
LH: loop header
LB: loop body
LE: loop exit
PB: predicated region body
PF: predicated region fallthrough
CT: control target
= control target key end

     0   :  { %v1658_v1 = vmov 0.0   ;;  %v24_v12 = vlaneseq  ;;  %vm1659_vm1 = vmmov 1   ;;  %vm617_vm9 = vcmask 1040384   ;;  %s1661_s27 = smov 16   ;;  %s1662_s12 = smov 32   ;;  %s2047_s1 = inlined_call_operand.vmem [shape: bf16[3,128,128], index: 1, kind: input, shape index: {}]   ;;  %s2048_s0 = inlined_call_operand.vmem [shape: f32[32,128], index: 0, kind: input, shape index: {}]   ;;  %s2049_s2 = inlined_call_operand.vmem [shape: bf16[128,128], index: 2, kind: input, shape index: {}]   ;;  %s2050_s3 = inlined_call_operand.vmem [shape: bf16[3,128,128], index: 3, kind: input, shape index: {}]   ;;  %s2051_s4 = inlined_call_operand.vmem [shape: f32[3,128], index: 4, kind: input, shape index: {}]   ;;  %s2052_s5 = inlined_call_operand.vmem [shape: f32[3,128], index: 5, kind: input, shape index: {}]   ;;  %s2053_s6 = inlined_call_operand.vmem [shape: f32[32,128], index: 6, kind: output, shape index: {}]  }
   0x1   :  { %v1582_v0 = vld [vmem:[%s2047_s1 + $0x40] sm:$0xff]   ;;  %85 = vst [vmem:[#allocation2 + $0x7] sm:$0x1] %v1658_v1  ;;  %86 = vst [vmem:[#allocation2 + $0x28] sm:$0x1] %v1658_v1  ;;  %v1583_v2 = vld [vmem:[%s2047_s1 + $0x48] sm:$0xff]  }
   0x2   :  { %1420 = vmatprep.subr.bf16.mxu0 %v1582_v0  ;;  %v1584_v3 = vld [vmem:[%s2047_s1 + $0x50] sm:$0xff]   ;;  %v1585_v4 = vld [vmem:[%s2047_s1 + $0x58] sm:$0xff]   ;;  %v87_v5 = vld [vmem:[%s2048_s0] sm:$0xff]  ;;  %v1732_v14 = vshrl.u32 %v24_v12, 7  ;;  %s1663_s20 = smov 64   ;;  %vm1103_vm10 = vcmask 1041408  }
   0x3   :  { %1421 = vmatpush3.bf16.msra.mxu0 %v1582_v0  ;;  %v88_v6 = vld [vmem:[%s2048_s0 + $0x8] sm:$0xff]  ;;  %91 = vst [vmem:[#allocation2 + $0x8] sm:$0xff] %v87_v5  ;;  %v89_v8 = vld [vmem:[%s2048_s0 + $0x10] sm:$0xff]  ;;  %v90_v9 = vld [vmem:[%s2048_s0 + $0x18] sm:$0xff] }
   0x4   :  { %1422 = vmatprep.subr.bf16.mxu0 %v1583_v2  ;;  %92 = vst [vmem:[#allocation2 + $0x10] sm:$0xff] %v88_v6  ;;  %v99_v7 = vpack.c.bf16 %v88_v6, %v87_v5  ;;  %93 = vst [vmem:[#allocation2 + $0x18] sm:$0xff] %v89_v8  ;;  %v1586_v10 = vld [vmem:[%s2047_s1 + $0x60] sm:$0xff]   ;;  %v1587_v11 = vld [vmem:[%s2047_s1 + $0x68] sm:$0xff]   ;;  %v33_v16 = vand.u32 15, %v1732_v14  ;;  %v1741_v20 = vpack.c.bf16 %v90_v9, %v89_v8  ;;  %v27_v29 = vadd.s32 16, %v1732_v14 }
   0x5   :  { %94 = vst [vmem:[#allocation2 + $0x20] sm:$0xff] %v90_v9  ;;  %v1588_v13 = vld [vmem:[%s2047_s1 + $0x70] sm:$0xff]   ;;  %v1589_v15 = vld [vmem:[%s2047_s1 + $0x78] sm:$0xff]   ;;  %v1590_v17 = vld [vmem:[%s2047_s1] sm:$0xff]   ;;  %v26_v30 = vadd.s32 8, %v1732_v14  ;;  %v28_v49 = vadd.s32 24, %v1732_v14 }
   0x6   :  { %1436 = vmatprep.mubr.bf16.mxu0 %v99_v7  ;;  %1496 = vmatprep.mubr.bf16.mxu1 %v99_v7  ;;  %vm77_vm0 = vcmp.ne.s32.totalorder %v33_v16, 0  ;;  %v1591_v22 = vld [vmem:[%s2047_s1 + $0x8] sm:$0xff]   ;;  %v1592_v24 = vld [vmem:[%s2047_s1 + $0x10] sm:$0xff]   ;;  %v1593_v25 = vld [vmem:[%s2047_s1 + $0x18] sm:$0xff]   ;;  %v47_v32 = vand.u32 15, %v27_v29 }
   0x7   :  { %1423 = vmatpush3.bf16.msra.mxu0 %v1583_v2  ;;  %vm1747_vm2 = vmpackc.low %vm1659_vm1, %vm77_vm0  ;;  %v1594_v26 = vld [vmem:[%s2047_s1 + $0x20] sm:$0xff]   ;;  %v1595_v27 = vld [vmem:[%s2047_s1 + $0x28] sm:$0xff]   ;;  %v40_v33 = vand.u32 15, %v26_v30  ;;  %v54_v51 = vand.u32 15, %v28_v49 }
   0x8   :  { %1424 = vmatprep.subr.bf16.mxu0 %v1584_v3  ;;  %v1596_v28 = vld [vmem:[%s2047_s1 + $0x30] sm:$0xff]   ;;  %v1597_v31 = vld [vmem:[%s2047_s1 + $0x38] sm:$0xff]   ;;  %v1598_v36 = vld [vmem:[%s2047_s1 + $0x80] sm:$0xff]   ;;  %vm79_vm3 = vcmp.ne.s32.totalorder %v47_v32, 0 }
   0x9   :  { %vm82_vm4 = vcmp.ne.s32.totalorder %v40_v33, 15  ;;  %vm1778_vm5 = vmpackc.low %vm1659_vm1, %vm79_vm3  ;;  %v1599_v42 = vld [vmem:[%s2047_s1 + $0x88] sm:$0xff]   ;;  %v1600_v44 = vld [vmem:[%s2047_s1 + $0x90] sm:$0xff]   ;;  %vm84_vm7 = vcmp.ne.s32.totalorder %v54_v51, 15 }
   0xa   :  { %v101_v18 = vld [vmem:[#allocation2 + $0x7] sm:$0xff]  ;;  %vm1786_vm6 = vmpackc.low %vm82_vm4, %vm1659_vm1  ;;  %v1601_v45 = vld [vmem:[%s2047_s1 + $0x98] sm:$0xff]  }
   0xb   :  { %1425 = vmatpush3.bf16.msra.mxu0 %v1584_v3  ;;  %v102_v19 = vld [vmem:[#allocation2 + $0xf] sm:$0xff]  ;;  %v103_v34 = vld [vmem:[#allocation2 + $0x17] sm:$0xff]  ;;  %v1602_v46 = vld [vmem:[%s2047_s1 + $0xa0] sm:$0xff]  }
   0xc   :  { %1426 = vmatprep.subr.bf16.mxu0 %v1585_v4  ;;  %v1239_v21 = vpack.c.bf16 %v102_v19, %v101_v18  ;;  %v104_v35 = vld [vmem:[#allocation2 + $0x1f] sm:$0xff]  ;;  %v117_v37 = vld [vmem:[#allocation2 + $0x9] sm:$0xff]  ;;  %v118_v38 = vld [vmem:[#allocation2 + $0x11] sm:$0xff] }
   0xd   :  { %v1242_v39 = vpack.c.bf16 %v104_v35, %v103_v34  ;;  %v1269_v41 = vpack.c.bf16 %v118_v38, %v117_v37  ;;  %v1603_v47 = vld [vmem:[%s2047_s1 + $0xa8] sm:$0xff]   ;;  %v1604_v48 = vld [vmem:[%s2047_s1 + $0xb0] sm:$0xff]   ;;  %v1605_v50 = vld [vmem:[%s2047_s1 + $0xb8] sm:$0xff]   ;;  %s1660_s1 = smov 8  }
   0xe   :  { %v119_v52 = vld [vmem:[#allocation2 + $0x19] sm:$0xff]  ;;  %v120_v53 = vld [vmem:[#allocation2 + $0x21] sm:$0xff]  ;;  %vm1814_vm8 = vmpackc.low %vm84_vm7, %vm1659_vm1 }
   0xf   :  { %1427 = vmatpush3.bf16.msra.mxu0 %v1585_v4  ;;  %v1272_v54 = vpack.c.bf16 %v120_v53, %v119_v52  ;;  %v1609_v29 = vld [vmem:[%s2049_s2 + $0x18] sm:$0xff]   ;;  %v1610_v30 = vld [vmem:[%s2049_s2 + $0x20] sm:$0xff]   ;;  %v1612_v32 = vld [vmem:[%s2049_s2 + $0x30] sm:$0xff]  }
  0x10   :  { %1428 = vmatprep.subr.bf16.mxu0 %v1586_v10  ;;  %v1613_v33 = vld [vmem:[%s2049_s2 + $0x38] sm:$0xff]   ;;  %v1615_v37 = vld [vmem:[%s2050_s3 + $0x48] sm:$0xff]   ;;  %v1616_v38 = vld [vmem:[%s2050_s3 + $0x50] sm:$0xff]  }
  0x11   :  { %v1628_v23 = vld [vmem:[%s2050_s3 + $0x30] sm:$0xff]  }
  0x13   :  { %1429 = vmatpush3.bf16.msra.mxu0 %v1586_v10 }
  0x14   :  { %1430 = vmatprep.subr.bf16.mxu0 %v1587_v11 }
  0x17   :  { %1431 = vmatpush3.bf16.msra.mxu0 %v1587_v11 }
  0x18   :  { %1432 = vmatprep.subr.bf16.mxu0 %v1588_v13 }
  0x1b   :  { %1433 = vmatpush3.bf16.msra.mxu0 %v1588_v13 }
  0x1c   :  { %1434 = vmatprep.subr.bf16.mxu0 %v1589_v15 }
  0x1f   :  { %1435 = vmatpush3.bf16.msra.mxu0 %v1589_v15 }
  0x20   :  { %1440 = vmatprep.subr.bf16.mxu0 %v1590_v17 }
  0x22   :  { %1437 = vmatmul.mubr.bf16.vlgmr.msra.gmra.mrb[0].mxu0 %v1741_v20 }
  0x23   :  { %1441 = vmatpush3.bf16.msra.mxu0 %v1590_v17  ;;  %1456 = vmatprep.mubr.msk.bf16.mxu0 %vm1747_vm2, %v1239_v21 }
  0x24   :  { %1442 = vmatprep.subr.bf16.mxu0 %v1591_v22 }
  0x27   :  { %1443 = vmatpush3.bf16.msra.mxu0 %v1591_v22 }
  0x28   :  { %1444 = vmatprep.subr.bf16.mxu0 %v1592_v24 }
  0x2b   :  { %1445 = vmatpush3.bf16.msra.mxu0 %v1592_v24  ;;  %v1606_v24 = vld [vmem:[%s2049_s2] sm:$0xff]  }
  0x2c   :  { %1446 = vmatprep.subr.bf16.mxu0 %v1593_v25  ;;  %1480 = vmatprep.subr.bf16.mxu1 %v1606_v24 }
  0x2d   :  { %1481 = vmatpush3.bf16.msra.mxu1 %v1606_v24 }
  0x2f   :  { %1447 = vmatpush3.bf16.msra.mxu0 %v1593_v25  ;;  %v1607_v25 = vld [vmem:[%s2049_s2 + $0x8] sm:$0xff]  }
  0x30   :  { %1448 = vmatprep.subr.bf16.mxu0 %v1594_v26  ;;  %1482 = vmatprep.subr.bf16.mxu1 %v1607_v25 }
  0x31   :  { %1483 = vmatpush3.bf16.msra.mxu1 %v1607_v25 }
  0x33   :  { %1449 = vmatpush3.bf16.msra.mxu0 %v1594_v26  ;;  %v1608_v26 = vld [vmem:[%s2049_s2 + $0x10] sm:$0xff]  }
  0x34   :  { %1450 = vmatprep.subr.bf16.mxu0 %v1595_v27  ;;  %1484 = vmatprep.subr.bf16.mxu1 %v1608_v26 }
  0x35   :  { %1485 = vmatpush3.bf16.msra.mxu1 %v1608_v26 }
  0x36   :  { %1486 = vmatprep.subr.bf16.mxu1 %v1609_v29 }
  0x37   :  { %1451 = vmatpush3.bf16.msra.mxu0 %v1595_v27 }
  0x38   :  { %1452 = vmatprep.subr.bf16.mxu0 %v1596_v28 }
  0x39   :  { %1487 = vmatpush3.bf16.msra.mxu1 %v1609_v29 }
  0x3a   :  { %1488 = vmatprep.subr.bf16.mxu1 %v1610_v30 }
  0x3b   :  { %1453 = vmatpush3.bf16.msra.mxu0 %v1596_v28 }
  0x3c   :  { %1454 = vmatprep.subr.bf16.mxu0 %v1597_v31 }
  0x3d   :  { %1489 = vmatpush3.bf16.msra.mxu1 %v1610_v30  ;;  %v1624_v30 = vld [vmem:[%s2050_s3 + $0x10] sm:$0xff]  }
  0x3f   :  { %1455 = vmatpush3.bf16.msra.mxu0 %v1597_v31  ;;  %v1611_v31 = vld [vmem:[%s2049_s2 + $0x28] sm:$0xff]  }
  0x40   :  { %1460 = vmatprep.subr.bf16.mxu0 %v1598_v36  ;;  %1490 = vmatprep.subr.bf16.mxu1 %v1611_v31 }
  0x41   :  { %1491 = vmatpush3.bf16.msra.mxu1 %v1611_v31 }
  0x42   :  { %1457 = vmatmul.mubr.msk.bf16.vlgmr.msra.gmra.mrb[0].mxu0 %vm1778_vm5, %v1242_v39  ;;  %1492 = vmatprep.subr.bf16.mxu1 %v1612_v32  ;;  %v1618_v39 = vld [vmem:[%s2050_s3 + $0x60] sm:$0xff]  }
  0x43   :  { %1461 = vmatpush3.bf16.msra.mxu0 %v1598_v36  ;;  %1476 = vmatprep.mubr.msk.bf16.mxu0 %vm1786_vm6, %v1269_v41  ;;  %v1614_v36 = vld [vmem:[%s2050_s3 + $0x40] sm:$0xff]   ;;  %v1619_v41 = vld [vmem:[%s2050_s3 + $0x68] sm:$0xff]  }
  0x44   :  { %1462 = vmatprep.subr.bf16.mxu0 %v1599_v42 }
  0x45   :  { %1493 = vmatpush3.bf16.msra.mxu1 %v1612_v32 }
  0x46   :  { %1494 = vmatprep.subr.bf16.mxu1 %v1613_v33 }
  0x47   :  { %1463 = vmatpush3.bf16.msra.mxu0 %v1599_v42  ;;  %v1620_v42 = vld [vmem:[%s2050_s3 + $0x70] sm:$0xff]  }
  0x48   :  { %1464 = vmatprep.subr.bf16.mxu0 %v1600_v44 }
  0x49   :  { %1495 = vmatpush3.bf16.msra.mxu1 %v1613_v33  ;;  %v1625_v33 = vld [vmem:[%s2050_s3 + $0x18] sm:$0xff]  }
  0x4a   :  { %1500 = vmatprep.subr.bf16.mxu1 %v1614_v36 }
  0x4b   :  { %1465 = vmatpush3.bf16.msra.mxu0 %v1600_v44  ;;  %v1621_v44 = vld [vmem:[%s2050_s3 + $0x78] sm:$0xff]  }
  0x4c   :  { %1466 = vmatprep.subr.bf16.mxu0 %v1601_v45  ;;  %1497 = vmatmul.mubr.bf16.vlgmr.msra.gmra.mrb[0].mxu1 %v1741_v20  ;;  %v1617_v20 = vld [vmem:[%s2050_s3 + $0x58] sm:$0xff]  }
  0x4d   :  { %1501 = vmatpush3.bf16.msra.mxu1 %v1614_v36  ;;  %v1629_v36 = vld [vmem:[%s2050_s3 + $0x38] sm:$0xff]  }
  0x4e   :  { %1502 = vmatprep.subr.bf16.mxu1 %v1615_v37 }
  0x4f   :  { %1467 = vmatpush3.bf16.msra.mxu0 %v1601_v45  ;;  %v1622_v45 = vld [vmem:[%s2050_s3] sm:$0xff]  }
  0x50   :  { %1468 = vmatprep.subr.bf16.mxu0 %v1602_v46 }
  0x51   :  { %1503 = vmatpush3.bf16.msra.mxu1 %v1615_v37  ;;  %v1630_v37 = vld [vmem:[%s2050_s3 + $0x80] sm:$0xff]  }
  0x52   :  { %1504 = vmatprep.subr.bf16.mxu1 %v1616_v38 }
  0x53   :  { %1469 = vmatpush3.bf16.msra.mxu0 %v1602_v46 }
  0x54   :  { %1470 = vmatprep.subr.bf16.mxu0 %v1603_v47 }
  0x55   :  { %1505 = vmatpush3.bf16.msra.mxu1 %v1616_v38 }
  0x56   :  { %1506 = vmatprep.subr.bf16.mxu1 %v1617_v20 }
  0x57   :  { %1471 = vmatpush3.bf16.msra.mxu0 %v1603_v47 }
  0x58   :  { %1472 = vmatprep.subr.bf16.mxu0 %v1604_v48 }
  0x59   :  { %1507 = vmatpush3.bf16.msra.mxu1 %v1617_v20 }
  0x5a   :  { %1508 = vmatprep.subr.bf16.mxu1 %v1618_v39 }
  0x5b   :  { %1473 = vmatpush3.bf16.msra.mxu0 %v1604_v48 }
  0x5c   :  { %1474 = vmatprep.subr.bf16.mxu0 %v1605_v50 }
  0x5d   :  { %1509 = vmatpush3.bf16.msra.mxu1 %v1618_v39 }
  0x5e   :  { %1510 = vmatprep.subr.bf16.mxu1 %v1619_v41 }
  0x5f   :  { %1475 = vmatpush3.bf16.msra.mxu0 %v1605_v50 }
  0x61   :  { %1511 = vmatpush3.bf16.msra.mxu1 %v1619_v41 }
  0x62   :  { %1477 = vmatmul.mubr.msk.bf16.vlgmr.msra.gmra.mrb[0].mxu0 %vm1814_vm8, %v1272_v54  ;;  %1512 = vmatprep.subr.bf16.mxu1 %v1620_v42  ;;  %v637_v54 = vld [vmem:[%s2051_s4] sm:$0x1] }
  0x65   :  { %1513 = vmatpush3.bf16.msra.mxu1 %v1620_v42 }
  0x66   :  { %1514 = vmatprep.subr.bf16.mxu1 %v1621_v44 }
  0x69   :  { %1515 = vmatpush3.bf16.msra.mxu1 %v1621_v44  ;;  %v1631_v44 = vld [vmem:[%s2050_s3 + $0x88] sm:$0xff]  }
  0x6a   :  { %1520 = vmatprep.subr.bf16.mxu1 %v1622_v45 }
 0x135   :  { %v1820_v56 = vpop.f32.mrb[0].mxu0 }
 0x136   :  { %v1822_v57 = vpop.f32.mrb[1].mxu0  ;;  %v606_v63 = vmul.f32 %v1820_v56, %v1820_v56 }
 0x137   :  { %v1824_v58 = vpop.f32.mrb[2].mxu0  ;;  %v604_v60 = vmul.f32 %v1822_v57, %v1822_v57 }
 0x138   :  { %v1826_v59 = vpop.f32.mrb[3].mxu0  ;;  %v607_v2 = vmul.f32 %v1824_v58, %v1824_v58 }
 0x139   :  { %v595_v61 = vadd.f32 %v1826_v59, %v1822_v57  ;;  %v605_v62 = vmul.f32 %v1826_v59, %v1826_v59 }
 0x13b   :  { %v596_v0 = vadd.f32 %v1820_v56, %v595_v61  ;;  %v608_v1 = vadd.f32 %v605_v62, %v604_v60  ;;  %v1901_v60 = vsub.s32 0, %v1732_v14 }
 0x13d   :  { %v597_v3 = vadd.f32 %v1824_v58, %v596_v0  ;;  %v609_v4 = vadd.f32 %v608_v1, %v606_v63  ;;  %v644_v63 = vld [vmem:[%s2052_s5] sm:$0x1] }
 0x13f   :  { %v598_v5 = vrot.slane %v597_v3, 4  ;;  %v610_v6 = vadd.f32 %v609_v4, %v607_v2 }
 0x141   :  { %v599_v7 = vadd.f32 %v598_v5, %v597_v3  ;;  %v611_v8 = vrot.slane %v610_v6, 4 }
 0x143   :  { %v600_v9 = vrot.slane %v599_v7, 2  ;;  %v612_v10 = vadd.f32 %v611_v8, %v610_v6 }
 0x145   :  { %v601_v11 = vadd.f32 %v600_v9, %v599_v7  ;;  %v613_v12 = vrot.slane %v612_v10, 2 }
 0x147   :  { %v602_v13 = vrot.slane %v601_v11, 1  ;;  %v614_v15 = vadd.f32 %v613_v12, %v612_v10 }
 0x149   :  { %v615_v16 = vrot.slane %v614_v15, 1  ;;  %v603_v17 = vadd.f32 %v602_v13, %v601_v11 }
 0x14b   :  { %v616_v18 = vadd.f32 %v615_v16, %v614_v15 }
 0x14d   :  { %v618_v19 = vsel %vm617_vm9, %v603_v17, %v616_v18 }
 0x14e   :  { %619 = vrot.lane.b32.xlu0 %v618_v19, %s1660_s1 }
 0x1c0   :  { %v620_v21 = vpop.permute.xlu0 %619 }
 0x1c1   :  { %v621_v22 = vadd.f32 %v620_v21, %v618_v19 }
 0x1c3   :  { %622 = vrot.lane.b32.xlu0 %v621_v22, %s1661_s27 }
 0x235   :  { %v623_v27 = vpop.permute.xlu0 %622 }
 0x236   :  { %v624_v28 = vadd.f32 %v623_v27, %v621_v22 }
 0x238   :  { %625 = vrot.lane.b32.xlu1 %v624_v28, %s1662_s12 }
 0x2aa   :  { %v626_v34 = vpop.permute.xlu1 %625 }
 0x2ab   :  { %v627_v35 = vadd.f32 %v626_v34, %v624_v28  ;;  %v1623_v28 = vld [vmem:[%s2050_s3 + $0x8] sm:$0xff]   ;;  %v1626_v34 = vld [vmem:[%s2050_s3 + $0x20] sm:$0xff]  }
 0x2ad   :  { %628 = vrot.lane.b32.xlu1 %v627_v35, %s1663_s20 }
 0x31f   :  { %v629_v46 = vpop.permute.xlu1 %628 }
 0x320   :  { %v630_v47 = vadd.f32 %v629_v46, %v627_v35  ;;  %v1627_v35 = vld [vmem:[%s2050_s3 + $0x28] sm:$0xff]   ;;  %v1632_v46 = vld [vmem:[%s2050_s3 + $0x90] sm:$0xff]  }
 0x322   :  { %v631_v48 = vmul.f32 0.001953125, %v630_v47  ;;  %v1948_v47 = vpop.f32.mrb[0].mxu1 }
 0x324   :  { %v632_v49 = vmul.f32 %v631_v48, %v631_v48 }
 0x326   :  { %v634_v50 = vrot.slane %v632_v49, 7  ;;  %v1953_v49 = vpop.f32.mrb[1].mxu1 }
 0x327   :  { %v1086_v40 = vmul.f32 %v1953_v49, %v1953_v49  ;;  %v1957_v43 = vpop.f32.mrb[2].mxu1 }
 0x328   :  { %v636_v51 = vsub.f32 %v631_v48, %v634_v50  ;;  %v1959_v50 = vpop.f32.mrb[3].mxu1 }
 0x32a   :  { %v638_v52 = vadd.f32 1e-05, %v636_v51  ;;  %v1088_v51 = vmul.f32 %v1948_v47, %v1948_v47 }
 0x32c   :  { %1638 = vrsqrt.f32 %v638_v52  ;;  %v1077_v52 = vadd.f32 %v1959_v50, %v1953_v49 }
 0x336   :  { %v1639_v53 = vpop.eup %1638 }
 0x337   :  { %v641_v61 = vrot.slane %v1639_v53, 1  ;;  %v1087_v53 = vmul.f32 %v1959_v50, %v1959_v50 }
 0x339   :  { %v643_v62 = vmul.f32 %v641_v61, %v637_v54  ;;  %v1634_v54 = vld [vmem:[%s2050_s3 + $0xa0] sm:$0xff]   ;;  %v1089_v61 = vmul.f32 %v1957_v43, %v1957_v43 }
 0x33b   :  { %v645_v0 = vmul.f32 %v643_v62, %v631_v48  ;;  %v650_v1 = vrot.slane %v643_v62, %v1901_v60  ;;  %v1633_v48 = vld [vmem:[%s2050_s3 + $0x98] sm:$0xff]   ;;  %v1078_v62 = vadd.f32 %v1948_v47, %v1077_v52 }
 0x33d   :  { %v646_v2 = vsub.f32 %v644_v63, %v645_v0  ;;  %v651_v3 = vmul.f32 %v650_v1, %v1822_v57  ;;  %v652_v4 = vmul.f32 %v650_v1, %v1826_v59  ;;  %v653_v5 = vmul.f32 %v1820_v56, %v650_v1 }
 0x33e   :  { %v654_v6 = vmul.f32 %v1824_v58, %v650_v1  ;;  %v1090_v63 = vadd.f32 %v1087_v53, %v1086_v40  ;;  %v1079_v0 = vadd.f32 %v1957_v43, %v1078_v62 }
 0x33f   :  { %v658_v14 = vrot.slane %v646_v2, %v1901_v60  ;;  %v1635_v2 = vld [vmem:[%s2050_s3 + $0xa8] sm:$0xff]  }
 0x340   :  { %v1091_v1 = vadd.f32 %v1090_v63, %v1088_v51 }
 0x341   :  { %v659_v7 = vadd.f32 %v658_v14, %v651_v3  ;;  %v660_v8 = vadd.f32 %v658_v14, %v652_v4  ;;  %v661_v9 = vadd.f32 %v658_v14, %v653_v5  ;;  %v662_v10 = vadd.f32 %v658_v14, %v654_v6  ;;  %v1636_v14 = vld [vmem:[%s2050_s3 + $0xb0] sm:$0xff]  }
 0x342   :  { %v1080_v3 = vrot.slane %v1079_v0, 4  ;;  %v1092_v4 = vadd.f32 %v1091_v1, %v1089_v61 }
 0x343   :  { %v663_v11 = vmul.f32 0.5, %v659_v7  ;;  %v664_v12 = vmul.f32 0.5, %v660_v8  ;;  %v665_v13 = vmul.f32 0.5, %v661_v9  ;;  %v666_v15 = vmul.f32 0.5, %v662_v10 }
 0x344   :  { %v1081_v5 = vadd.f32 %v1080_v3, %v1079_v0  ;;  %v1093_v6 = vrot.slane %v1092_v4, 4 }
 0x345   :  { %1640 = vtanh.f32 %v663_v11  ;;  %v1637_v11 = vld [vmem:[%s2050_s3 + $0xb8] sm:$0xff]  }
 0x346   :  { %1642 = vtanh.f32 %v664_v12  ;;  %v1082_v7 = vrot.slane %v1081_v5, 2  ;;  %v1094_v8 = vadd.f32 %v1093_v6, %v1092_v4  ;;  %v1149_v6 = vld [vmem:[%s2051_s4 + $0x2] sm:$0x1] }
 0x347   :  { %1644 = vtanh.f32 %v665_v13 }
 0x348   :  { %1646 = vtanh.f32 %v666_v15  ;;  %v1083_v9 = vadd.f32 %v1082_v7, %v1081_v5  ;;  %v1095_v10 = vrot.slane %v1094_v8, 2 }
 0x34a   :  { %v1096_v12 = vadd.f32 %v1095_v10, %v1094_v8  ;;  %v1084_v13 = vrot.slane %v1083_v9, 1 }
 0x34c   :  { %v1097_v15 = vrot.slane %v1096_v12, 1 }
 0x34f   :  { %v1641_v57 = vpop.eup %1640 }
 0x350   :  { %v1643_v59 = vpop.eup %1642  ;;  %v671_v16 = vmul.f32 0.5, %v1641_v57 }
 0x351   :  { %v1645_v56 = vpop.eup %1644  ;;  %v672_v17 = vmul.f32 0.5, %v1643_v59 }
 0x352   :  { %v1647_v58 = vpop.eup %1646  ;;  %v673_v18 = vmul.f32 0.5, %v1645_v56  ;;  %v675_v19 = vadd.f32 0.5, %v671_v16  ;;  %v1085_v16 = vadd.f32 %v1084_v13, %v1083_v9  ;;  %v1098_v56 = vadd.f32 %v1097_v15, %v1096_v12 }
 0x353   :  { %v674_v21 = vmul.f32 0.5, %v1647_v58  ;;  %v676_v22 = vadd.f32 0.5, %v672_v17 }
 0x354   :  { %v677_v24 = vadd.f32 0.5, %v673_v18  ;;  %679 = vst [vmem:[#allocation2 + $0x8] sm:$0xff] %v675_v19  ;;  %v1099_v17 = vsel %vm617_vm9, %v1085_v16, %v1098_v56  ;;  %v1153_v16 = vld [vmem:[%s2052_s5 + $0x2] sm:$0x1] }
 0x355   :  { %v678_v25 = vadd.f32 0.5, %v674_v21  ;;  %680 = vst [vmem:[#allocation2 + $0x10] sm:$0xff] %v676_v22  ;;  %v687_v26 = vpack.c.bf16 %v676_v22, %v675_v19 }
 0x356   :  { %681 = vst [vmem:[#allocation2 + $0x18] sm:$0xff] %v677_v24 }
 0x357   :  { %682 = vst [vmem:[#allocation2 + $0x20] sm:$0xff] %v678_v25  ;;  %1516 = vmatprep.mubr.bf16.mxu1 %v687_v26  ;;  %v688_v27 = vpack.c.bf16 %v678_v25, %v677_v24 }
 0x359   :  { %1517 = vmatmul.mubr.bf16.vlgmr.msra.gmra.mrb[4].mxu1 %v688_v27 }
 0x35a   :  { %1521 = vmatpush3.bf16.msra.mxu1 %v1622_v45 }
 0x35b   :  { %v689_v29 = vld [vmem:[#allocation2 + $0x7] sm:$0xff]  ;;  %1522 = vmatprep.subr.bf16.mxu1 %v1623_v28 }
 0x35c   :  { %v690_v31 = vld [vmem:[#allocation2 + $0xf] sm:$0xff] }
 0x35d   :  { %v1315_v32 = vpack.c.bf16 %v690_v31, %v689_v29  ;;  %v691_v38 = vld [vmem:[#allocation2 + $0x17] sm:$0xff]  ;;  %v697_v39 = vld [vmem:[#allocation2 + $0x9] sm:$0xff] }
 0x35e   :  { %1523 = vmatpush3.bf16.msra.mxu1 %v1623_v28  ;;  %v692_v20 = vld [vmem:[#allocation2 + $0x1f] sm:$0xff]  ;;  %v698_v41 = vld [vmem:[#allocation2 + $0x11] sm:$0xff] }
 0x35f   :  { %1536 = vmatprep.mubr.msk.bf16.mxu1 %vm1747_vm2, %v1315_v32  ;;  %1524 = vmatprep.subr.bf16.mxu1 %v1624_v30  ;;  %v1318_v42 = vpack.c.bf16 %v692_v20, %v691_v38  ;;  %v1345_v45 = vpack.c.bf16 %v698_v41, %v697_v39  ;;  %v699_v57 = vld [vmem:[#allocation2 + $0x19] sm:$0xff]  ;;  %v700_v59 = vld [vmem:[#allocation2 + $0x21] sm:$0xff] }
 0x360   :  { %v1348_v58 = vpack.c.bf16 %v700_v59, %v699_v57 }
 0x362   :  { %1525 = vmatpush3.bf16.msra.mxu1 %v1624_v30 }
 0x363   :  { %1526 = vmatprep.subr.bf16.mxu1 %v1625_v33 }
 0x366   :  { %1527 = vmatpush3.bf16.msra.mxu1 %v1625_v33 }
 0x367   :  { %1528 = vmatprep.subr.bf16.mxu1 %v1626_v34 }
 0x36a   :  { %1529 = vmatpush3.bf16.msra.mxu1 %v1626_v34 }
 0x36b   :  { %1530 = vmatprep.subr.bf16.mxu1 %v1627_v35 }
 0x36e   :  { %1531 = vmatpush3.bf16.msra.mxu1 %v1627_v35 }
 0x36f   :  { %1532 = vmatprep.subr.bf16.mxu1 %v1628_v23 }
 0x372   :  { %1533 = vmatpush3.bf16.msra.mxu1 %v1628_v23 }
 0x373   :  { %1534 = vmatprep.subr.bf16.mxu1 %v1629_v36 }
 0x376   :  { %1535 = vmatpush3.bf16.msra.mxu1 %v1629_v36 }
 0x377   :  { %1540 = vmatprep.subr.bf16.mxu1 %v1630_v37 }
 0x379   :  { %1537 = vmatmul.mubr.msk.bf16.vlgmr.msra.gmra.mrb[4].mxu1 %vm1778_vm5, %v1318_v42 }
 0x37a   :  { %1541 = vmatpush3.bf16.msra.mxu1 %v1630_v37  ;;  %1556 = vmatprep.mubr.msk.bf16.mxu1 %vm1786_vm6, %v1345_v45  ;;  %v1101_v45 = vrot.slane %v1099_v17, 6 }
 0x37b   :  { %1542 = vmatprep.subr.bf16.mxu1 %v1631_v44 }
 0x37e   :  { %1543 = vmatpush3.bf16.msra.mxu1 %v1631_v44 }
 0x37f   :  { %1544 = vmatprep.subr.bf16.mxu1 %v1632_v46 }
 0x382   :  { %1545 = vmatpush3.bf16.msra.mxu1 %v1632_v46 }
 0x383   :  { %1546 = vmatprep.subr.bf16.mxu1 %v1633_v48 }
 0x386   :  { %1547 = vmatpush3.bf16.msra.mxu1 %v1633_v48 }
 0x387   :  { %1548 = vmatprep.subr.bf16.mxu1 %v1634_v54 }
 0x38a   :  { %1549 = vmatpush3.bf16.msra.mxu1 %v1634_v54 }
 0x38b   :  { %1550 = vmatprep.subr.bf16.mxu1 %v1635_v2 }
 0x38e   :  { %1551 = vmatpush3.bf16.msra.mxu1 %v1635_v2 }
 0x38f   :  { %1552 = vmatprep.subr.bf16.mxu1 %v1636_v14 }
 0x392   :  { %1553 = vmatpush3.bf16.msra.mxu1 %v1636_v14  ;;  %v1123_v14 = vld [vmem:[%s2051_s4 + $0x1] sm:$0x1] }
 0x393   :  { %1554 = vmatprep.subr.bf16.mxu1 %v1637_v11 }
 0x396   :  { %1555 = vmatpush3.bf16.msra.mxu1 %v1637_v11  ;;  %v1130_v11 = vld [vmem:[%s2052_s5 + $0x1] sm:$0x1] }
 0x399   :  { %1557 = vmatmul.mubr.msk.bf16.vlgmr.msra.gmra.mrb[4].mxu1 %vm1814_vm8, %v1348_v58 }
 0x46c   :  { %v1986_v18 = vpop.f32.mrb[4].mxu1 }
 0x46d   :  { %v1988_v19 = vpop.f32.mrb[5].mxu1  ;;  %v1065_v55 = vmul.f32 %v1986_v18, %v1986_v18 }
 0x46e   :  { %v1990_v21 = vpop.f32.mrb[6].mxu1  ;;  %v1063_v24 = vmul.f32 %v1988_v19, %v1988_v19 }
 0x46f   :  { %v1992_v22 = vpop.f32.mrb[7].mxu1  ;;  %v1066_v29 = vmul.f32 %v1990_v21, %v1990_v21 }
 0x470   :  { %v1054_v25 = vadd.f32 %v1992_v22, %v1988_v19  ;;  %v1064_v26 = vmul.f32 %v1992_v22, %v1992_v22 }
 0x472   :  { %v1055_v27 = vadd.f32 %v1986_v18, %v1054_v25  ;;  %v1067_v28 = vadd.f32 %v1064_v26, %v1063_v24 }
 0x474   :  { %v1056_v30 = vadd.f32 %v1990_v21, %v1055_v27  ;;  %v1068_v31 = vadd.f32 %v1067_v28, %v1065_v55 }
 0x476   :  { %v1057_v32 = vrot.slane %v1056_v30, 4  ;;  %v1069_v33 = vadd.f32 %v1068_v31, %v1066_v29 }
 0x478   :  { %v1058_v34 = vadd.f32 %v1057_v32, %v1056_v30  ;;  %v1070_v35 = vrot.slane %v1069_v33, 4 }
 0x47a   :  { %v1059_v23 = vrot.slane %v1058_v34, 2  ;;  %v1071_v36 = vadd.f32 %v1070_v35, %v1069_v33 }
 0x47c   :  { %v1060_v37 = vadd.f32 %v1059_v23, %v1058_v34  ;;  %v1072_v38 = vrot.slane %v1071_v36, 2 }
 0x47e   :  { %v1061_v20 = vrot.slane %v1060_v37, 1  ;;  %v1073_v39 = vadd.f32 %v1072_v38, %v1071_v36 }
 0x480   :  { %v1074_v41 = vrot.slane %v1073_v39, 1  ;;  %v1062_v42 = vadd.f32 %v1061_v20, %v1060_v37 }
 0x482   :  { %v1075_v44 = vadd.f32 %v1074_v41, %v1073_v39 }
 0x484   :  { %v1076_v46 = vsel %vm617_vm9, %v1062_v42, %v1075_v44 }
 0x485   :  { %v1104_v48 = vsel %vm1103_vm10, %v1076_v46, %v1101_v45 }
 0x486   :  { %1105 = vrot.lane.b32.xlu0 %v1104_v48, %s1660_s1 }
 0x4f8   :  { %v1106_v40 = vpop.permute.xlu0 %1105 }
 0x4f9   :  { %v1107_v51 = vadd.f32 %v1106_v40, %v1104_v48 }
 0x4fb   :  { %1108 = vrot.lane.b32.xlu1 %v1107_v51, %s1661_s27 }
 0x56d   :  { %v1109_v52 = vpop.permute.xlu1 %1108 }
 0x56e   :  { %v1110_v53 = vadd.f32 %v1109_v52, %v1107_v51 }
 0x570   :  { %1111 = vrot.lane.b32.xlu0 %v1110_v53, %s1662_s12 }
 0x5e2   :  { %v1112_v54 = vpop.permute.xlu0 %1111 }
 0x5e3   :  { %v1113_v61 = vadd.f32 %v1112_v54, %v1110_v53 }
 0x5e5   :  { %1114 = vrot.lane.b32.xlu1 %v1113_v61, %s1663_s20 }
 0x657   :  { %v1115_v62 = vpop.permute.xlu1 %1114 }
 0x658   :  { %v1116_v63 = vadd.f32 %v1115_v62, %v1113_v61 }
 0x65a   :  { %v1117_v0 = vmul.f32 0.001953125, %v1116_v63 }
 0x65c   :  { %v1118_v1 = vmul.f32 %v1117_v0, %v1117_v0 }
 0x65e   :  { %v1120_v2 = vrot.slane %v1118_v1, 7 }
 0x660   :  { %v1122_v3 = vsub.f32 %v1117_v0, %v1120_v2 }
 0x662   :  { %v1124_v4 = vadd.f32 1e-05, %v1122_v3 }
 0x664   :  { %1648 = vrsqrt.f32 %v1124_v4 }
 0x66e   :  { %v1649_v5 = vpop.eup %1648 }
 0x66f   :  { %v1127_v7 = vrot.slane %v1649_v5, 1  ;;  %v1150_v8 = vrot.slane %v1649_v5, 3 }
 0x671   :  { %v1129_v9 = vmul.f32 %v1127_v7, %v1123_v14  ;;  %v1152_v10 = vmul.f32 %v1150_v8, %v1149_v6 }
 0x673   :  { %v1131_v12 = vmul.f32 %v1129_v9, %v1117_v0  ;;  %v1155_v13 = vrot.slane %v1152_v10, 6  ;;  %v1136_v57 = vrot.slane %v1129_v9, %v1901_v60  ;;  %v1165_v56 = vrot.slane %v1152_v10, %v1901_v60 }
 0x675   :  { %v1132_v15 = vsub.f32 %v1130_v11, %v1131_v12  ;;  %v1157_v59 = vmul.f32 %v1155_v13, %v1117_v0  ;;  %v1137_v24 = vmul.f32 %v1136_v57, %v1988_v19  ;;  %v1138_v26 = vmul.f32 %v1136_v57, %v1992_v22 }
 0x676   :  { %v1139_v55 = vmul.f32 %v1986_v18, %v1136_v57  ;;  %v1140_v27 = vmul.f32 %v1990_v21, %v1136_v57  ;;  %v1166_v28 = vmul.f32 %v1165_v56, %v1953_v49  ;;  %v1167_v29 = vmul.f32 %v1165_v56, %v1959_v50 }
 0x677   :  { %v1159_v17 = vrot.slane %v1157_v59, 2  ;;  %v1144_v58 = vrot.slane %v1132_v15, %v1901_v60  ;;  %v1168_v30 = vmul.f32 %v1948_v47, %v1165_v56  ;;  %v1169_v31 = vmul.f32 %v1957_v43, %v1165_v56 }
 0x679   :  { %v1161_v25 = vsub.f32 %v1153_v16, %v1159_v17  ;;  %v1145_v33 = vadd.f32 %v1144_v58, %v1137_v24  ;;  %v1146_v34 = vadd.f32 %v1144_v58, %v1138_v26  ;;  %v1147_v19 = vadd.f32 %v1144_v58, %v1139_v55 }
 0x67a   :  { %v1148_v35 = vadd.f32 %v1144_v58, %v1140_v27 }
 0x67b   :  { %v1173_v32 = vrot.slane %v1161_v25, %v1901_v60 }
 0x67d   :  { %v1174_v23 = vadd.f32 %v1173_v32, %v1166_v28  ;;  %v1175_v22 = vadd.f32 %v1173_v32, %v1167_v29  ;;  %v1176_v36 = vadd.f32 %v1173_v32, %v1168_v30  ;;  %v1177_v18 = vadd.f32 %v1173_v32, %v1169_v31 }
 0x67f   :  { %v1178_v37 = vadd.f32 %v1174_v23, %v1145_v33  ;;  %v1179_v21 = vadd.f32 %v1175_v22, %v1146_v34  ;;  %v1180_v38 = vadd.f32 %v1176_v36, %v1147_v19  ;;  %v1181_v49 = vadd.f32 %v1177_v18, %v1148_v35 }
 0x681   :  { %v1182_v20 = vmul.f32 0.5, %v1178_v37  ;;  %v1183_v50 = vmul.f32 0.5, %v1179_v21  ;;  %v1184_v39 = vmul.f32 0.5, %v1180_v38  ;;  %v1185_v47 = vmul.f32 0.5, %v1181_v49 }
 0x683   :  { %1650 = vtanh.f32 %v1182_v20 }
 0x684   :  { %1652 = vtanh.f32 %v1183_v50 }
 0x685   :  { %1654 = vtanh.f32 %v1184_v39 }
 0x686   :  { %1656 = vtanh.f32 %v1185_v47 }
 0x68d   :  { %v1651_v60 = vpop.eup %1650 }
 0x68e   :  { %v1653_v43 = vpop.eup %1652  ;;  %v1190_v41 = vmul.f32 0.5, %v1651_v60 }
 0x68f   :  { %v1655_v42 = vpop.eup %1654  ;;  %v1191_v44 = vmul.f32 0.5, %v1653_v43 }
 0x690   :  { %v1657_v45 = vpop.eup %1656  ;;  %v1192_v46 = vmul.f32 0.5, %v1655_v42  ;;  %v1194_v48 = vadd.f32 0.5, %v1190_v41 }
 0x691   :  { %v1193_v40 = vmul.f32 0.5, %v1657_v45  ;;  %v1195_v51 = vadd.f32 0.5, %v1191_v44 }
 0x692   :  { %v1196_v52 = vadd.f32 0.5, %v1192_v46  ;;  %1198 = vst [vmem:[%s2053_s6] sm:$0xff] %v1194_v48 }
 0x693   :  { %v1197_v53 = vadd.f32 0.5, %v1193_v40  ;;  %1199 = vst [vmem:[%s2053_s6 + $0x8] sm:$0xff] %v1195_v51 }
 0x694   :  { %1200 = vst [vmem:[%s2053_s6 + $0x10] sm:$0xff] %v1196_v52 }
 0x695   :  { %1201 = vst [vmem:[%s2053_s6 + $0x18] sm:$0xff] %v1197_v53 }

</bundles_post_ra>
